<compile_context>
chip_gen: v7x
topology: tpu7x:2x2x1
jax: 0.10.0
libtpu: 0.0.40
codegen_flags: <defaults>
</compile_context>

<pallas_src>
import functools

import jax
import jax.numpy as jnp
from jax.experimental import pallas as pl
from jax.experimental.pallas import tpu as pltpu

_LANE = 128
_SUBLANE = 8


def _row_multiple(dtype):
    """Minimum legal tile-row multiple for a dtype (8 f32, 16 bf16, 32 i8)."""
    return max(_SUBLANE, 32 // jnp.dtype(dtype).itemsize)


def _preferred_tile_rows():
    """Generation-aware tile height (rows of 128 lanes)."""
    try:
        kind = jax.devices()[0].device_kind.lower()
    except Exception:
        return 2048
    if any(t in kind for t in ("v2", "v3", "v4", "v5")):
        return 2048   # v5e: 16 MiB scoped-VMEM default -> 1 MiB/input tile
    if "7" in kind:
        return 8192   # v7x: ~3.2 TB/s HBM, amortize the per-step overhead hard
    return 4096       # v6e and other recent single-TC parts


def _sse_kernel(x_ref, t_ref, o_ref, *, tile_rows, rows_total, k_steps, masked):
    """Accumulate a per-core (8, 128) partial sum of squared errors.

    x_ref, t_ref: VMEM (tile_rows, 128) tiles of x_hat / target.
    o_ref:        VMEM (1, 8, 128) per-core partial-SSE accumulator (output).
    Grid = (P, K): P parallel row-ranges (cores), K sequential chunks each.
    `masked` is a trace-time bool: when the chunk layout does not exactly
    cover rows_total, an iota row-mask zeroes padded / duplicated rows.
    """
    p = pl.program_id(0)
    k = pl.program_id(1)

    @pl.when(k == 0)
    def _():
        o_ref[...] = jnp.zeros_like(o_ref)

    d = x_ref[...].astype(jnp.float32) - t_ref[...].astype(jnp.float32)
    sq = d * d

    if masked:
        # Logical (unclamped) chunk index -> global row of each tile row.
        row_start = (p * k_steps + k) * tile_rows
        row_ids = row_start + jax.lax.broadcasted_iota(jnp.int32, sq.shape, 0)
        sq = jnp.where(row_ids < rows_total, sq, 0.0)

    # Fold (tile_rows, 128) -> (8, 128): vreg-wise VPU adds, no cross-lane XLU.
    partial = jnp.sum(sq.reshape(-1, _SUBLANE, _LANE), axis=0)
    o_ref[...] = o_ref[...] + partial[None, :, :]


def _sse_pallas(x_flat, t_flat, tile_rows_hint=None):
    """Sum of squared errors between two equal-length 1-D arrays."""
    n = x_flat.shape[0]
    sub_mult = max(_row_multiple(x_flat.dtype), _row_multiple(t_flat.dtype))

    rows_full = n // _LANE
    lane_tail = n - rows_full * _LANE

    # Too small for a single legal tile: plain-JAX reduce (negligible work).
    if rows_full < sub_mult:
        d = x_flat.astype(jnp.float32) - t_flat.astype(jnp.float32)
        return jnp.sum(d * d)

    preferred = tile_rows_hint if tile_rows_hint is not None else _preferred_tile_rows()
    preferred = max(sub_mult, (preferred // sub_mult) * sub_mult)
    tile_rows = min(preferred, (rows_full // sub_mult) * sub_mult)

    num_chunks = (rows_full + tile_rows - 1) // tile_rows
    # Always split across 2 cores when there is more than one chunk (v7x
    # megacore); the clamped index_map + row mask keep odd counts correct.
    num_cores = 2 if num_chunks >= 2 else 1
    k_steps = (num_chunks + num_cores - 1) // num_cores
    masked = (num_cores * k_steps * tile_rows != rows_full)

    bulk = rows_full * _LANE
    x2d = x_flat[:bulk].reshape(rows_full, _LANE)
    t2d = t_flat[:bulk].reshape(rows_full, _LANE)

    # 2 inputs x 2 pipeline buffers + tiny output, plus headroom.
    tile_bytes = tile_rows * _LANE * (x2d.dtype.itemsize + t2d.dtype.itemsize)
    vmem_limit = int(2 * tile_bytes
                     + 2 * num_cores * _SUBLANE * _LANE * 4
                     + (8 << 20))

    def in_map(p, k):
        # Clamp so the extra step of an uneven core split maps to a valid
        # block; its contribution is zeroed by the row mask in the kernel.
        return (jnp.minimum(p * k_steps + k, num_chunks - 1), 0)

    kernel = functools.partial(
        _sse_kernel,
        tile_rows=tile_rows, rows_total=rows_full,
        k_steps=k_steps, masked=masked,
    )

    cost = pl.CostEstimate(
        flops=3 * rows_full * _LANE,
        transcendentals=0,
        bytes_accessed=int(x2d.nbytes + t2d.nbytes
                           + num_cores * _SUBLANE * _LANE * 4),
    )

    partials = pl.pallas_call(
        kernel,
        out_shape=jax.ShapeDtypeStruct((num_cores, _SUBLANE, _LANE),
                                       jnp.float32),
        grid=(num_cores, k_steps),
        in_specs=[
            pl.BlockSpec((tile_rows, _LANE), in_map),
            pl.BlockSpec((tile_rows, _LANE), in_map),
        ],
        out_specs=pl.BlockSpec((1, _SUBLANE, _LANE), lambda p, k: (p, 0, 0)),
        compiler_params=pltpu.CompilerParams(
            dimension_semantics=("parallel", "arbitrary"),
            vmem_limit_bytes=vmem_limit,
        ),
        cost_estimate=cost,
    )(x2d, t2d)

    sse = jnp.sum(partials)

    # Sub-row tail (< 128 elements, usually empty): trivial plain-JAX reduce.
    if lane_tail:
        dt = (x_flat[bulk:].astype(jnp.float32)
              - t_flat[bulk:].astype(jnp.float32))
        sse = sse + jnp.sum(dt * dt)
    return sse


def rate_distortion_loss(output, target, lmbda, rd_weight=1.0):
    """JAX/Pallas equivalent of RateDistortionLoss.forward.

    output: dict with 'x_hat' (same shape as target) and 'bpp' (scalar).
    Returns dict with 'bpp_loss', 'mse_loss', 'rd_loss', 'loss' (f32 scalars).
    """
    x_hat = output["x_hat"]
    # TODO(synk): bpp is passed through verbatim, matching the PyTorch forward
    # (which reads output['bpp'] directly); upstream must compute it.
    bpp = jnp.asarray(output["bpp"], dtype=jnp.float32).reshape(())

    assert x_hat.shape == target.shape, "x_hat and target must share a shape"
    x_flat = jnp.ravel(x_hat)
    t_flat = jnp.ravel(target)
    n = x_flat.shape[0]

    sse = _sse_pallas(x_flat, t_flat)

    # n is a static Python int: take its reciprocal in double precision on the
    # host so very large element counts (> 2^24) do not bias the mean.
    mse = sse * jnp.float32(1.0 / float(n))
    rd = jnp.asarray(lmbda, dtype=jnp.float32) * mse + bpp
    loss = jnp.asarray(rd_weight, dtype=jnp.float32) * rd
    return {"bpp_loss": bpp, "mse_loss": mse, "rd_loss": rd, "loss": loss}


if __name__ == "__main__":
    key = jax.random.PRNGKey(0)
    k1, k2, k3 = jax.random.split(key, 3)

    # Small shapes consistent with an image-codec forward: NCHW = (2, 4, 16, 16)
    x_hat = jax.random.normal(k1, (2, 4, 16, 16), dtype=jnp.float32)
    target = jax.random.normal(k2, (2, 4, 16, 16), dtype=jnp.float32)
    bpp = jax.random.uniform(k3, (), dtype=jnp.float32)  # scalar bpp loss

    lmbda = 845.0      # first entry of lambda_I in the PyTorch module
    rd_weight = 1.0

    result = rate_distortion_loss({"x_hat": x_hat, "bpp": bpp}, target,
                                  lmbda, rd_weight)
    jax.block_until_ready(result)

    # Pure-JAX reference check (same semantics as the PyTorch forward).
    mse_ref = jnp.mean((x_hat - target) ** 2)
    rd_ref = lmbda * mse_ref + bpp
    loss_ref = rd_weight * rd_ref
    assert jnp.allclose(result["bpp_loss"], bpp, rtol=1e-6)
    assert jnp.allclose(result["mse_loss"], mse_ref, rtol=1e-5)
    assert jnp.allclose(result["rd_loss"], rd_ref, rtol=1e-5)
    assert jnp.allclose(result["loss"], loss_ref, rtol=1e-5)

    # Extra self-check: odd chunk count + partial last tile + <128-elem lane
    # tail, with a tiny forced tile so the clamped / masked paths execute.
    ky1, ky2 = jax.random.split(k3)
    a = jax.random.normal(ky1, (2880,), dtype=jnp.float32)
    b = jax.random.normal(ky2, (2880,), dtype=jnp.float32)
    sse = _sse_pallas(a, b, tile_rows_hint=8)
    sse_ref = jnp.sum((a - b) ** 2)
    jax.block_until_ready(sse)
    assert jnp.allclose(sse, sse_ref, rtol=1e-5)

    print("KERNEL_OK")
</pallas_src>

<mosaic_0001>
module attributes {stable_mosaic.version = 11 : i64} {
  func.func @_sse_kernel(%arg0: i32, %arg1: i32, %arg2: memref<16x128xf32, #tpu.memory_space<vmem>>, %arg3: memref<16x128xf32, #tpu.memory_space<vmem>>, %arg4: memref<1x8x128xf32, #tpu.memory_space<vmem>>) attributes {dimension_semantics = [#tpu.dimension_semantics<parallel>, #tpu.dimension_semantics<arbitrary>], iteration_bounds = array<i64: 1, 1>, scalar_prefetch = 0 : i64, scratch_operands = 0 : i64, tpu.core_type = #tpu.core_type<tc>, window_params = [{transform_indices = @transform_0, window_bounds = array<i64: 16, 128>}, {transform_indices = @transform_1, window_bounds = array<i64: 16, 128>}, {transform_indices = @transform_2, window_bounds = array<i64: 1, 8, 128>}]} {
    %c0_i32 = arith.constant 0 : i32
    %0 = arith.cmpi eq, %arg1, %c0_i32 : i32
    %1 = arith.extui %0 : i1 to i32
    %c0_i32_0 = arith.constant 0 : i32
    %2 = arith.cmpi ne, %1, %c0_i32_0 : i32
    scf.if %2 {
      %cst_10 = arith.constant 0.000000e+00 : f32
      %13 = vector.broadcast %cst_10 : f32 to vector<1x8x128xf32>
      %c0_11 = arith.constant 0 : index
      %c0_12 = arith.constant 0 : index
      %c0_13 = arith.constant 0 : index
      %14 = vector.load %arg4[%c0_11, %c0_12, %c0_13] : memref<1x8x128xf32, #tpu.memory_space<vmem>>, vector<1x8x128xf32>
      tpu.vector_store %arg4[%c0_11, %c0_12, %c0_13], %13 {strides = array<i32>} : memref<1x8x128xf32, #tpu.memory_space<vmem>>, vector<1x8x128xf32>,
    } else {
    }
    %c0 = arith.constant 0 : index
    %c0_1 = arith.constant 0 : index
    %3 = vector.load %arg2[%c0, %c0_1] : memref<16x128xf32, #tpu.memory_space<vmem>>, vector<16x128xf32>
    %c0_2 = arith.constant 0 : index
    %c0_3 = arith.constant 0 : index
    %4 = vector.load %arg3[%c0_2, %c0_3] : memref<16x128xf32, #tpu.memory_space<vmem>>, vector<16x128xf32>
    %5 = arith.subf %3, %4 : vector<16x128xf32>
    %6 = arith.mulf %5, %5 : vector<16x128xf32>
    %7 = vector.shape_cast %6 : vector<16x128xf32> to vector<2x8x128xf32>
    %cst = arith.constant dense<0.000000e+00> : vector<8x128xf32>
    %8 = vector.multi_reduction <add>, %7, %cst [0] : vector<2x8x128xf32> to vector<8x128xf32>
    %c0_4 = arith.constant 0 : index
    %c0_5 = arith.constant 0 : index
    %c0_6 = arith.constant 0 : index
    %9 = vector.load %arg4[%c0_4, %c0_5, %c0_6] : memref<1x8x128xf32, #tpu.memory_space<vmem>>, vector<1x8x128xf32>
    %10 = vector.shape_cast %8 : vector<8x128xf32> to vector<1x8x128xf32>
    %11 = arith.addf %9, %10 : vector<1x8x128xf32>
    %c0_7 = arith.constant 0 : index
    %c0_8 = arith.constant 0 : index
    %c0_9 = arith.constant 0 : index
    %12 = vector.load %arg4[%c0_7, %c0_8, %c0_9] : memref<1x8x128xf32, #tpu.memory_space<vmem>>, vector<1x8x128xf32>
    tpu.vector_store %arg4[%c0_7, %c0_8, %c0_9], %11 {strides = array<i32>} : memref<1x8x128xf32, #tpu.memory_space<vmem>>, vector<1x8x128xf32>,
    return
  }
  func.func @transform_0(%arg0: i32, %arg1: i32) -> (i32, i32) {
    %c1_i32 = arith.constant 1 : i32
    %0 = arith.muli %arg0, %c1_i32 : i32
    %1 = arith.addi %0, %arg1 : i32
    %c0_i32 = arith.constant 0 : i32
    %2 = arith.minsi %1, %c0_i32 : i32
    %c0_i32_0 = arith.constant 0 : i32
    %c0_i32_1 = arith.constant 0 : i32
    return %2, %c0_i32_0 : i32, i32
  }
  func.func @transform_1(%arg0: i32, %arg1: i32) -> (i32, i32) {
    %c1_i32 = arith.constant 1 : i32
    %0 = arith.muli %arg0, %c1_i32 : i32
    %1 = arith.addi %0, %arg1 : i32
    %c0_i32 = arith.constant 0 : i32
    %2 = arith.minsi %1, %c0_i32 : i32
    %c0_i32_0 = arith.constant 0 : i32
    %c0_i32_1 = arith.constant 0 : i32
    return %2, %c0_i32_0 : i32, i32
  }
  func.func @transform_2(%arg0: i32, %arg1: i32) -> (i32, i32, i32) {
    %c0_i32 = arith.constant 0 : i32
    %c0_i32_0 = arith.constant 0 : i32
    %c0_i32_1 = arith.constant 0 : i32
    return %arg0, %c0_i32, %c0_i32_0 : i32, i32, i32
  }
}

</mosaic_0001>

<bundles_post_ra>
// kernel: tpu_custom_call.1
= control target key start
LH: loop header
LB: loop body
LE: loop exit
PB: predicated region body
PF: predicated region fallthrough
CT: control target
= control target key end

     0   :  { %7 = vsyncpa [#allocation3], 0  ;;  %s231_s0 = inlined_call_operand.hbm [shape: f32[16,128], index: 0, kind: input, shape index: {}]   ;;  %s232_s1 = inlined_call_operand.hbm [shape: f32[16,128], index: 1, kind: input, shape index: {}]   ;;  %s233_s2 = inlined_call_operand.hbm [shape: f32[1,8,128], index: 2, kind: output, shape index: {}]  }
   0x1   :  { %8 = vsyncpa [#allocation6], 0 }
   0x2   :  { %9 = vsyncpa [#allocation4], 0  ;;  %s175_s9 = smov [#allocation2]   ;;  %s103_s13 = scalar_lea.hbm %s231_s0, 256 }
   0x3   :  { %s21_s10 = sshll.u32 %s175_s9, 4  ;;  %p104_p0 = scmp.ne.s32.totalorder %s231_s0, %s103_s13  ;;  %s22_s10 = int_to_ptr.vmem [resolvable:$true] %s21_s10 }
   0x4   :  { %p107_p1 = scmp.lt.u32.totalorder %s103_s13, %s231_s0 }
   0x6   :  { %p109_p2 = pnand %p107_p1, %p104_p0 }
   0x8   :  { %112 = shalt.err (!%p109_p2)
}
   0x9   :  { %s113_s18 = scalar_lea.vmem %s22_s10, 256  ;;  %p118_p4 = scmp.lt.s32.totalorder %s22_s10, %s22_s10 }
   0xa   :  { %p114_p3 = scmp.ne.s32.totalorder %s22_s10, %s113_s18  ;;  %p119_p5 = scmp.lt.s32.totalorder %s113_s18, %s113_s18 }
   0xc   :  { %p120_p6 = por %p119_p5, %p118_p4 }
   0xe   :  { %p121_p7 = pnand %p120_p6, %p114_p3 }
  0x10   :  { %124 = shalt.err (!%p121_p7)
}
  0x11   :  { %s176_s19 = smov 128   ;;  %s177_s20 = smov 8  }
  0x12   :  { %27 = dma.hbm_to_vmem [thread:$0]  %s231_s0, 256, %s22_s10, [#allocation3], %s176_s19, %s176_s19, %s177_s20  }
  0x13   :  { %s178_s23 = smov [#allocation5]   ;;  %s125_s27 = scalar_lea.hbm %s232_s1, 256 }
  0x14   :  { %s39_s24 = sshll.u32 %s178_s23, 4  ;;  %p126_p8 = scmp.ne.s32.totalorder %s232_s1, %s125_s27  ;;  %s40_s24 = int_to_ptr.vmem [resolvable:$true] %s39_s24 }
  0x15   :  { %p129_p9 = scmp.lt.u32.totalorder %s125_s27, %s232_s1 }
  0x17   :  { %p131_p10 = pnand %p129_p9, %p126_p8 }
  0x19   :  { %134 = shalt.err (!%p131_p10)
}
  0x1a   :  { %s135_s4 = scalar_lea.vmem %s40_s24, 256  ;;  %p140_p12 = scmp.lt.s32.totalorder %s40_s24, %s40_s24 }
  0x1b   :  { %p136_p11 = scmp.ne.s32.totalorder %s40_s24, %s135_s4  ;;  %p141_p13 = scmp.lt.s32.totalorder %s135_s4, %s135_s4 }
  0x1d   :  { %p142_p0 = por %p141_p13, %p140_p12 }
  0x1f   :  { %p143_p1 = pnand %p142_p0, %p136_p11 }
  0x21   :  { %146 = shalt.err (!%p143_p1)
}
  0x22   :  { %45 = dma.hbm_to_vmem [thread:$0]  %s232_s1, 256, %s40_s24, [#allocation6], %s176_s19, %s176_s19, %s177_s20  }
  0x23   :  { %169 = dma.done.wait [#allocation3], 256  }
  0x24   :  { %170 = vsyncadd [#allocation3], 4294967040 }
  0x25   :  { %171 = dma.done.wait [#allocation6], 256  }
  0x26   :  { %172 = vsyncadd [#allocation6], 4294967040  ;;  %v65_v0 = vld [vmem:[#allocation2] sm:$0xff]  ;;  %v66_v1 = vld [vmem:[#allocation2 + $0x8] sm:$0xff]  ;;  %s179_s6 = smov [#allocation7]  }
  0x27   :  { %v67_v2 = vld [vmem:[#allocation5] sm:$0xff]  ;;  %v68_v3 = vld [vmem:[#allocation5 + $0x8] sm:$0xff]  ;;  %s83_s7 = sshll.u32 %s179_s6, 4  ;;  %s84_s7 = int_to_ptr.vmem [resolvable:$true] %s83_s7 }
  0x28   :  { %v69_v4 = vsub.f32 %v65_v0, %v67_v2  ;;  %v70_v5 = vsub.f32 %v66_v1, %v68_v3  ;;  %s147_s8 = scalar_lea.vmem %s84_s7, 128  ;;  %p152_p3 = scmp.lt.s32.totalorder %s84_s7, %s84_s7 }
  0x29   :  { %p148_p2 = scmp.ne.s32.totalorder %s84_s7, %s147_s8  ;;  %p153_p4 = scmp.lt.s32.totalorder %s147_s8, %s147_s8 }
  0x2a   :  { %v71_v6 = vmul.f32 %v69_v4, %v69_v4  ;;  %v72_v7 = vmul.f32 %v70_v5, %v70_v5 }
  0x2b   :  { %p154_p5 = por %p153_p4, %p152_p3 }
  0x2c   :  { %v73_v8 = vadd.f32 %v72_v7, %v71_v6 }
  0x2d   :  { %p155_p6 = pnand %p154_p5, %p148_p2 }
  0x2e   :  { %76 = vst [vmem:[#allocation7] sm:$0xff] %v73_v8 }
  0x2f   :  { %158 = shalt.err (!%p155_p6)
}
  0x30   :  { %s159_s10 = scalar_lea.hbm %s233_s2, 128 }
  0x31   :  { %p160_p7 = scmp.ne.s32.totalorder %s233_s2, %s159_s10  ;;  %p163_p8 = scmp.lt.u32.totalorder %s159_s10, %s233_s2 }
  0x33   :  { %p165_p9 = pnand %p163_p8, %p160_p7 }
  0x35   :  { %168 = shalt.err (!%p165_p9)
}
  0x36   :  { %86 = dma.vmem_to_hbm [thread:$0]  %s84_s7, 128, %s233_s2, [#allocation4]  }
  0x37   :  { %173 = dma.done.wait [#allocation4], 128  }
  0x38   :  { %174 = vsyncadd [#allocation4], 4294967168 }
  0x39   :  { %90 = vsyncpa [#allocation3], 1 }
  0x3a   :  { %91 = vsyncpa [#allocation6], 1 }
  0x3b   :  { %92 = vsyncpa [#allocation4], 1 }

</bundles_post_ra>
